<compile_context>
chip_gen: v7x
topology: tpu7x:2x2x1
jax: 0.10.0
libtpu: 0.0.40
codegen_flags: <defaults>
</compile_context>

<pallas_src>
import functools

import jax
import jax.numpy as jnp
from jax.experimental import pallas as pl
from jax.experimental.pallas import tpu as pltpu


def _cdiv(a, b):
    return -(-a // b)


def _round_up(a, b):
    return _cdiv(a, b) * b


def _vmem_capacity_bytes():
    try:
        return int(pltpu.get_tpu_info().vmem_capacity_bytes)
    except Exception:
        return 64 * 1024 * 1024  # conservative: v7x per-TensorCore VMEM


# ----------------------------- fused single-pass -----------------------------


def _ca_fused_kernel(x_ref, w1t_ref, b1_ref, w2t_ref, b2_ref, o_ref, *, inv_hw):
    xv = x_ref[...]                                                        # (TB, C, HW_pad)
    # Global average pool over the (zero-padded) flattened spatial axis, fp32.
    pooled = jnp.sum(xv.astype(jnp.float32), axis=2) * inv_hw              # (TB, C)
    # 1x1 conv #1 (C -> Cr) + bias + ReLU.
    h = jnp.maximum(
        jnp.dot(pooled, w1t_ref[...], preferred_element_type=jnp.float32)
        + b1_ref[...], 0.0)                                                # (TB, Cr)
    # 1x1 conv #2 (Cr -> C) + bias + sigmoid.
    s = jax.nn.sigmoid(
        jnp.dot(h, w2t_ref[...], preferred_element_type=jnp.float32)
        + b2_ref[...])                                                     # (TB, C)
    # Scale in the native dtype (no persistent fp32 copy of the block).
    o_ref[...] = (xv * s.astype(xv.dtype)[:, :, None]).astype(o_ref.dtype)


# ------------------------- two-phase (HW-tiled) path --------------------------


def _ca_pool_kernel(x_ref, pooled_ref):
    # Accumulate per-(b, c) sums over the HW-tile ("arbitrary") grid axis.
    @pl.when(pl.program_id(1) == 0)
    def _():
        pooled_ref[...] = jnp.zeros_like(pooled_ref)

    ps = jnp.sum(x_ref[...].astype(jnp.float32), axis=2)     # (1, C)
    pooled_ref[...] += ps[:, None, :]                         # (1, 1, C)


def _ca_scale_kernel(pooled_ref, w1t_ref, b1_ref, w2t_ref, b2_ref, x_ref, o_ref,
                     *, inv_hw):
    pooled = pooled_ref[0] * inv_hw                            # (1, C), fp32
    h = jnp.maximum(
        jnp.dot(pooled, w1t_ref[...], preferred_element_type=jnp.float32)
        + b1_ref[...], 0.0)
    s = jax.nn.sigmoid(
        jnp.dot(h, w2t_ref[...], preferred_element_type=jnp.float32)
        + b2_ref[...])                                         # (1, C)
    xv = x_ref[...]
    o_ref[...] = (xv * s.astype(xv.dtype)[:, :, None]).astype(o_ref.dtype)


# ---------------------------------- wrapper -----------------------------------


def ca_layer(x, w1, b1, w2, b2, *, force_two_phase=False):
    """Channel attention. x:(B,C,H,W); w1:(Cr,C); b1:(Cr,); w2:(C,Cr); b2:(C,)."""
    B, C, H, W = x.shape
    Cr = w1.shape[0]
    HW = H * W
    itemsize = jnp.dtype(x.dtype).itemsize

    # Pre-transposed fp32 weights -> plain (M,K)@(K,N) matmuls inside the kernel.
    w1t = jnp.transpose(w1).astype(jnp.float32)      # (C, Cr)
    w2t = jnp.transpose(w2).astype(jnp.float32)      # (Cr, C)
    b1_2d = b1.reshape(1, Cr).astype(jnp.float32)
    b2_2d = b2.reshape(1, C).astype(jnp.float32)
    weight_bytes = (w1t.size + w2t.size + b1_2d.size + b2_2d.size) * 4

    vmem_cap = _vmem_capacity_bytes()
    # in + out blocks, each double-buffered => ~4x block bytes live in VMEM.
    max_block_bytes = vmem_cap // 6
    target_block_bytes = min(8 << 20, max_block_bytes)

    per_image_bytes = C * _round_up(HW, 128) * itemsize
    inv_hw = 1.0 / float(HW)

    cost = pl.CostEstimate(
        flops=2 * B * C * HW + 4 * B * C * Cr,
        transcendentals=B * C,
        bytes_accessed=2 * B * C * HW * itemsize + weight_bytes,
    )

    if per_image_bytes <= max_block_bytes and not force_two_phase:
        # -------------- single-pass fused path: (TB, C, HW_pad) blocks --------------
        HW_pad = _round_up(HW, 128)   # lane-dense stores (unmasked vst)
        TB = max(1, min(B, target_block_bytes // per_image_bytes))
        # Prefer a TB that divides B (avoids a batch-pad copy) if it keeps blocks big.
        tb_div = max(d for d in range(1, TB + 1) if B % d == 0)
        if 2 * tb_div >= TB:
            TB = tb_div
        # v7x has 2 TensorCores: keep >=2 parallel grid steps if blocks stay >=1 MiB.
        if B > 1 and _cdiv(B, TB) < 2 and _cdiv(B, 2) * per_image_bytes >= (1 << 20):
            TB = _cdiv(B, 2)
        grid_b = _cdiv(B, TB)
        B_pad = grid_b * TB

        x_flat = x.reshape(B, C, HW)
        if HW_pad != HW or B_pad != B:
            x_flat = jnp.pad(x_flat, ((0, B_pad - B), (0, 0), (0, HW_pad - HW)))

        block_bytes = TB * C * HW_pad * itemsize
        vmem_limit = int(min(max(4 * block_bytes + weight_bytes + (4 << 20), 32 << 20),
                             int(0.9 * vmem_cap)))

        out_flat = pl.pallas_call(
            functools.partial(_ca_fused_kernel, inv_hw=inv_hw),
            out_shape=jax.ShapeDtypeStruct((B_pad, C, HW_pad), x.dtype),
            grid_spec=pltpu.PrefetchScalarGridSpec(
                num_scalar_prefetch=0,
                grid=(grid_b,),
                in_specs=[
                    pl.BlockSpec((TB, C, HW_pad), lambda b: (b, 0, 0)),   # x
                    pl.BlockSpec((C, Cr), lambda b: (0, 0)),              # w1^T
                    pl.BlockSpec((1, Cr), lambda b: (0, 0)),              # b1
                    pl.BlockSpec((Cr, C), lambda b: (0, 0)),              # w2^T
                    pl.BlockSpec((1, C), lambda b: (0, 0)),               # b2
                ],
                out_specs=pl.BlockSpec((TB, C, HW_pad), lambda b: (b, 0, 0)),
            ),
            compiler_params=pltpu.CompilerParams(
                dimension_semantics=("parallel",),
                vmem_limit_bytes=vmem_limit),
            cost_estimate=cost,
        )(x_flat, w1t, b1_2d, w2t, b2_2d)

        return out_flat[:B, :, :HW].reshape(B, C, H, W)

    # ------------- two-phase HW-tiled path (large images / small VMEM) -------------
    # TODO(synk): if C alone is so large that a (C, 128) tile overflows VMEM, a
    # channel-tiled variant would be needed; not implemented here.
    HW128 = _round_up(HW, 128)
    max_hw_tile = max(128, (target_block_bytes // (C * itemsize)) // 128 * 128)
    n_t = _cdiv(HW128, max_hw_tile)
    hw_tile = _round_up(_cdiv(HW128, n_t), 128)   # minimizes zero-padding waste
    HW_pad = n_t * hw_tile
    grid_b = B

    x_flat = x.reshape(B, C, HW)
    if HW_pad != HW:
        x_flat = jnp.pad(x_flat, ((0, 0), (0, 0), (0, HW_pad - HW)))

    x_block_bytes = C * hw_tile * itemsize
    vmem_limit1 = int(min(max(2 * x_block_bytes + (4 << 20), 32 << 20),
                          int(0.9 * vmem_cap)))
    vmem_limit2 = int(min(max(4 * x_block_bytes + weight_bytes + (4 << 20), 32 << 20),
                          int(0.9 * vmem_cap)))

    # Phase 1: per-(b, c) sums over HW, accumulated across HW tiles.
    pooled = pl.pallas_call(
        _ca_pool_kernel,
        out_shape=jax.ShapeDtypeStruct((B, 1, C), jnp.float32),
        grid_spec=pltpu.PrefetchScalarGridSpec(
            num_scalar_prefetch=0,
            grid=(grid_b, n_t),
            in_specs=[pl.BlockSpec((1, C, hw_tile), lambda b, t: (b, 0, t))],
            out_specs=pl.BlockSpec((1, 1, C), lambda b, t: (b, 0, 0)),
        ),
        compiler_params=pltpu.CompilerParams(
            dimension_semantics=("parallel", "arbitrary"),
            vmem_limit_bytes=vmem_limit1),
    )(x_flat)

    # Phase 2: recompute the tiny FC->sigmoid per block and scale each HW tile.
    out_flat = pl.pallas_call(
        functools.partial(_ca_scale_kernel, inv_hw=inv_hw),
        out_shape=jax.ShapeDtypeStruct((B, C, HW_pad), x.dtype),
        grid_spec=pltpu.PrefetchScalarGridSpec(
            num_scalar_prefetch=0,
            grid=(grid_b, n_t),
            in_specs=[
                pl.BlockSpec((1, 1, C), lambda b, t: (b, 0, 0)),          # pooled sums
                pl.BlockSpec((C, Cr), lambda b, t: (0, 0)),               # w1^T
                pl.BlockSpec((1, Cr), lambda b, t: (0, 0)),               # b1
                pl.BlockSpec((Cr, C), lambda b, t: (0, 0)),               # w2^T
                pl.BlockSpec((1, C), lambda b, t: (0, 0)),                # b2
                pl.BlockSpec((1, C, hw_tile), lambda b, t: (b, 0, t)),    # x tile
            ],
            out_specs=pl.BlockSpec((1, C, hw_tile), lambda b, t: (b, 0, t)),
        ),
        compiler_params=pltpu.CompilerParams(
            dimension_semantics=("parallel", "parallel"),
            vmem_limit_bytes=vmem_limit2),
        cost_estimate=cost,
    )(pooled, w1t, b1_2d, w2t, b2_2d, x_flat)

    return out_flat[:, :, :HW].reshape(B, C, H, W)


def _reference(x, w1, b1, w2, b2):
    # Pure-JAX reference matching the PyTorch forward exactly.
    pooled = jnp.mean(x, axis=(2, 3))                          # (B, C)
    h = jnp.maximum(pooled @ w1.T + b1, 0.0)                   # (B, Cr)
    s = jax.nn.sigmoid(h @ w2.T + b2)                          # (B, C)
    return x * s[:, :, None, None]


if __name__ == "__main__":
    # Small deterministic config consistent with CALayer(channel=8, reduction=4).
    B, C, H, W = 2, 8, 16, 16
    reduction = 4
    Cr = C // reduction

    key = jax.random.PRNGKey(0)
    kx, kw1, kb1, kw2, kb2 = jax.random.split(key, 5)

    x = jax.random.normal(kx, (B, C, H, W), dtype=jnp.float32)
    # Conv2d(C, Cr, 1) weight (Cr, C, 1, 1) -> (Cr, C); bias (Cr,)
    w1 = jax.random.normal(kw1, (Cr, C), dtype=jnp.float32) * 0.1
    b1 = jax.random.normal(kb1, (Cr,), dtype=jnp.float32) * 0.1
    # Conv2d(Cr, C, 1) weight (C, Cr, 1, 1) -> (C, Cr); bias (C,)
    w2 = jax.random.normal(kw2, (C, Cr), dtype=jnp.float32) * 0.1
    b2 = jax.random.normal(kb2, (C,), dtype=jnp.float32) * 0.1

    ref = _reference(x, w1, b1, w2, b2)

    # Fast fused path (blocks fit VMEM).
    out = jax.block_until_ready(ca_layer(x, w1, b1, w2, b2))
    assert out.shape == (B, C, H, W)
    assert jnp.allclose(out, ref, atol=1e-5, rtol=1e-5), "fused path mismatch"

    # Two-phase HW-tiled path (used automatically for large images / small VMEM).
    out2 = jax.block_until_ready(ca_layer(x, w1, b1, w2, b2, force_two_phase=True))
    assert jnp.allclose(out2, ref, atol=1e-5, rtol=1e-5), "two-phase path mismatch"

    # bf16 activations: multiply kept in native dtype (no persistent fp32 copy).
    xb = x.astype(jnp.bfloat16)
    outb = jax.block_until_ready(ca_layer(xb, w1, b1, w2, b2))
    refb = _reference(xb.astype(jnp.float32), w1, b1, w2, b2)
    assert outb.dtype == jnp.bfloat16
    assert jnp.allclose(outb.astype(jnp.float32), refb, atol=2e-2, rtol=2e-2), \
        "bf16 path mismatch"

    print("KERNEL_OK")
</pallas_src>

<mosaic_0001>
module attributes {stable_mosaic.version = 11 : i64} {
  func.func @_ca_fused_kernel(%arg0: i32, %arg1: memref<2x8x256xf32, #tpu.memory_space<vmem>>, %arg2: memref<8x2xf32, #tpu.memory_space<vmem>>, %arg3: memref<1x2xf32, #tpu.memory_space<vmem>>, %arg4: memref<2x8xf32, #tpu.memory_space<vmem>>, %arg5: memref<1x8xf32, #tpu.memory_space<vmem>>, %arg6: memref<2x8x256xf32, #tpu.memory_space<vmem>>) attributes {dimension_semantics = [#tpu.dimension_semantics<parallel>], iteration_bounds = array<i64: 1>, scalar_prefetch = 0 : i64, scratch_operands = 0 : i64, tpu.core_type = #tpu.core_type<tc>, window_params = [{transform_indices = @transform_0, window_bounds = array<i64: 2, 8, 256>}, {pipeline_mode = #tpu.pipeline_mode<synchronous>, transform_indices = @transform_1, window_bounds = array<i64: 8, 2>}, {pipeline_mode = #tpu.pipeline_mode<synchronous>, transform_indices = @transform_2, window_bounds = array<i64: 1, 2>}, {pipeline_mode = #tpu.pipeline_mode<synchronous>, transform_indices = @transform_3, window_bounds = array<i64: 2, 8>}, {pipeline_mode = #tpu.pipeline_mode<synchronous>, transform_indices = @transform_4, window_bounds = array<i64: 1, 8>}, {transform_indices = @transform_5, window_bounds = array<i64: 2, 8, 256>}]} {
    %c0 = arith.constant 0 : index
    %c0_0 = arith.constant 0 : index
    %c0_1 = arith.constant 0 : index
    %0 = vector.load %arg1[%c0, %c0_0, %c0_1] : memref<2x8x256xf32, #tpu.memory_space<vmem>>, vector<2x8x256xf32>
    %cst = arith.constant dense<0.000000e+00> : vector<2x8xf32>
    %1 = vector.multi_reduction <add>, %0, %cst [2] : vector<2x8x256xf32> to vector<2x8xf32>
    %cst_2 = arith.constant 3.906250e-03 : f32
    %2 = vector.broadcast %cst_2 : f32 to vector<2x8xf32>
    %3 = arith.mulf %1, %2 : vector<2x8xf32>
    %c0_3 = arith.constant 0 : index
    %c0_4 = arith.constant 0 : index
    %4 = vector.load %arg2[%c0_3, %c0_4] : memref<8x2xf32, #tpu.memory_space<vmem>>, vector<8x2xf32>
    %cst_5 = arith.constant dense<0.000000e+00> : vector<2x2xf32>
    %5 = tpu.matmul %3, %4, %cst_5 {dimension_numbers = #tpu.dot_dimension_numbers<[1], [0], [0], [1], [0, 0, 1, 1], [], []>} : vector<2x8xf32>, vector<8x2xf32>, vector<2x2xf32> -> vector<2x2xf32>
    %c0_6 = arith.constant 0 : index
    %c0_7 = arith.constant 0 : index
    %6 = vector.load %arg3[%c0_6, %c0_7] : memref<1x2xf32, #tpu.memory_space<vmem>>, vector<1x2xf32>
    %7 = vector.broadcast %6 : vector<1x2xf32> to vector<2x2xf32>
    %8 = arith.addf %5, %7 : vector<2x2xf32>
    %cst_8 = arith.constant 0.000000e+00 : f32
    %9 = vector.broadcast %cst_8 : f32 to vector<2x2xf32>
    %10 = arith.maximumf %8, %9 : vector<2x2xf32>
    %c0_9 = arith.constant 0 : index
    %c0_10 = arith.constant 0 : index
    %11 = vector.load %arg4[%c0_9, %c0_10] : memref<2x8xf32, #tpu.memory_space<vmem>>, vector<2x8xf32>
    %cst_11 = arith.constant dense<0.000000e+00> : vector<2x8xf32>
    %12 = tpu.matmul %10, %11, %cst_11 {dimension_numbers = #tpu.dot_dimension_numbers<[1], [0], [0], [1], [0, 0, 1, 1], [], []>} : vector<2x2xf32>, vector<2x8xf32>, vector<2x8xf32> -> vector<2x8xf32>
    %c0_12 = arith.constant 0 : index
    %c0_13 = arith.constant 0 : index
    %13 = vector.load %arg5[%c0_12, %c0_13] : memref<1x8xf32, #tpu.memory_space<vmem>>, vector<1x8xf32>
    %14 = vector.broadcast %13 : vector<1x8xf32> to vector<2x8xf32>
    %15 = arith.addf %12, %14 : vector<2x8xf32>
    %16 = arith.negf %15 : vector<2x8xf32>
    %17 = math.exp %16 : vector<2x8xf32>
    %cst_14 = arith.constant 1.000000e+00 : f32
    %18 = vector.broadcast %cst_14 : f32 to vector<2x8xf32>
    %19 = arith.addf %18, %17 : vector<2x8xf32>
    %20 = arith.divf %18, %19 : vector<2x8xf32>
    %21 = vector.shape_cast %20 : vector<2x8xf32> to vector<2x8x1xf32>
    %22 = vector.broadcast %21 : vector<2x8x1xf32> to vector<2x8x256xf32>
    %23 = arith.mulf %0, %22 : vector<2x8x256xf32>
    %c0_15 = arith.constant 0 : index
    %c0_16 = arith.constant 0 : index
    %c0_17 = arith.constant 0 : index
    %24 = vector.load %arg6[%c0_15, %c0_16, %c0_17] : memref<2x8x256xf32, #tpu.memory_space<vmem>>, vector<2x8x256xf32>
    tpu.vector_store %arg6[%c0_15, %c0_16, %c0_17], %23 {strides = array<i32>} : memref<2x8x256xf32, #tpu.memory_space<vmem>>, vector<2x8x256xf32>,
    return
  }
  func.func @transform_0(%arg0: i32) -> (i32, i32, i32) {
    %c0_i32 = arith.constant 0 : i32
    %c0_i32_0 = arith.constant 0 : i32
    %c0_i32_1 = arith.constant 0 : i32
    return %arg0, %c0_i32, %c0_i32_0 : i32, i32, i32
  }
  func.func @transform_1(%arg0: i32) -> (i32, i32) {
    %c0_i32 = arith.constant 0 : i32
    %c0_i32_0 = arith.constant 0 : i32
    %c0_i32_1 = arith.constant 0 : i32
    return %c0_i32, %c0_i32_0 : i32, i32
  }
  func.func @transform_2(%arg0: i32) -> (i32, i32) {
    %c0_i32 = arith.constant 0 : i32
    %c0_i32_0 = arith.constant 0 : i32
    %c0_i32_1 = arith.constant 0 : i32
    return %c0_i32, %c0_i32_0 : i32, i32
  }
  func.func @transform_3(%arg0: i32) -> (i32, i32) {
    %c0_i32 = arith.constant 0 : i32
    %c0_i32_0 = arith.constant 0 : i32
    %c0_i32_1 = arith.constant 0 : i32
    return %c0_i32, %c0_i32_0 : i32, i32
  }
  func.func @transform_4(%arg0: i32) -> (i32, i32) {
    %c0_i32 = arith.constant 0 : i32
    %c0_i32_0 = arith.constant 0 : i32
    %c0_i32_1 = arith.constant 0 : i32
    return %c0_i32, %c0_i32_0 : i32, i32
  }
  func.func @transform_5(%arg0: i32) -> (i32, i32, i32) {
    %c0_i32 = arith.constant 0 : i32
    %c0_i32_0 = arith.constant 0 : i32
    %c0_i32_1 = arith.constant 0 : i32
    return %arg0, %c0_i32, %c0_i32_0 : i32, i32, i32
  }
}

</mosaic_0001>

<bundles_post_ra>
// kernel: tpu_custom_call.1
= control target key start
LH: loop header
LB: loop body
LE: loop exit
PB: predicated region body
PF: predicated region fallthrough
CT: control target
= control target key end

     0   :  { %10 = vsyncpa [#allocation3], 0  ;;  %s430_s0 = inlined_call_operand.hbm [shape: f32[2,8,256], index: 0, kind: input, shape index: {}]   ;;  %s431_s1 = inlined_call_operand.vmem [shape: f32[8,2], index: 1, kind: input, shape index: {}]   ;;  %s432_s2 = inlined_call_operand.vmem [shape: f32[1,2], index: 2, kind: input, shape index: {}]   ;;  %s433_s3 = inlined_call_operand.vmem [shape: f32[2,8], index: 3, kind: input, shape index: {}]   ;;  %s434_s4 = inlined_call_operand.vmem [shape: f32[1,8], index: 4, kind: input, shape index: {}]   ;;  %s435_s5 = inlined_call_operand.hbm [shape: f32[2,8,256], index: 5, kind: output, shape index: {}]  }
   0x1   :  { %11 = vsyncpa [#allocation4], 0  ;;  %s352_s18 = smov [#allocation2]   ;;  %s304_s22 = scalar_lea.hbm %s430_s0, 512 }
   0x2   :  { %s17_s19 = sshll.u32 %s352_s18, 4  ;;  %p305_p0 = scmp.ne.s32.totalorder %s430_s0, %s304_s22  ;;  %s18_s19 = int_to_ptr.vmem [resolvable:$true] %s17_s19 }
   0x3   :  { %p308_p1 = scmp.lt.u32.totalorder %s304_s22, %s430_s0 }
   0x5   :  { %p310_p2 = pnand %p308_p1, %p305_p0 }
   0x7   :  { %313 = shalt.err (!%p310_p2)
}
   0x8   :  { %s314_s27 = scalar_lea.vmem %s18_s19, 512  ;;  %p319_p4 = scmp.lt.s32.totalorder %s18_s19, %s18_s19 }
   0x9   :  { %p315_p3 = scmp.ne.s32.totalorder %s18_s19, %s314_s27  ;;  %p320_p5 = scmp.lt.s32.totalorder %s314_s27, %s314_s27 }
   0xb   :  { %p321_p6 = por %p320_p5, %p319_p4 }
   0xd   :  { %p322_p7 = pnand %p321_p6, %p315_p3 }
   0xf   :  { %325 = shalt.err (!%p322_p7)
}
  0x10   :  { %s353_s28 = smov 256   ;;  %s354_s29 = smov 16  }
  0x11   :  { %23 = dma.hbm_to_vmem [thread:$0]  %s430_s0, 512, %s18_s19, [#allocation3], %s353_s28, %s353_s28, %s354_s29  }
  0x12   :  { %348 = dma.done.wait [#allocation3], 512  }
  0x13   :  { %349 = vsyncadd [#allocation3], 4294966784  ;;  %v35_v0 = vld [vmem:[#allocation2] sm:$0xff]  ;;  %v36_v1 = vld [vmem:[#allocation2 + $0x8] sm:$0xff]  ;;  %v355_v7 = vmov 0.0   ;;  %vm356_vm0 = vmmov 0   ;;  %v57_v8 = vlaneseq }
  0x14   :  { %v37_v2 = vld [vmem:[#allocation2 + $0x10] sm:$0xff]  ;;  %v39_v3 = vadd.f32 %v36_v1, %v35_v0  ;;  %v38_v4 = vld [vmem:[#allocation2 + $0x18] sm:$0xff]  ;;  %v47_v6 = vld [vmem:[%s431_s1] sm:$0xff]  ;;  %284 = vmatprep.subr.mxu0 %v355_v7  ;;  %286 = vmatprep.mubr.msk.f32.mxu0 %vm356_vm0, %v355_v7  ;;  %vm67_vm1 = vcmask 1041409   ;;  %vm69_vm2 = vcmask 64512   ;;  %vm155_vm3 = vcmask 1041408  }
  0x15   :  { %v42_v5 = vadd.f32 %v38_v4, %v37_v2  ;;  %285 = vmatpush3.msra.mxu0 %v47_v6  ;;  %289 = vmatprep.subr.mxu1 %v355_v7  ;;  %v58_v9 = vand.u32 127, %v57_v8  ;;  %v60_v10 = vshrl.u32 %v57_v8, 7  ;;  %v143_v19 = vld [vmem:[%s433_s3] sm:$0x3]  ;;  %vm151_vm4 = vcmask 15360  }
  0x16   :  { %40 = vadd.xlane.f32.xlu0 %v39_v3  ;;  %291 = vmatprep.mubr.msk.f32.mxu1 %vm356_vm0, %v355_v7  ;;  %v274_v20 = vld [vmem:[%s432_s2] ss:$0 sm:$0xff]  ;;  %s357_s2 = smov [#allocation5]  }
  0x17   :  { %v61_v12 = vsub.s32 %v58_v9, %v60_v10  ;;  %290 = vmatpush3.msk.msra.mxu1 %vm155_vm3, %v143_v19  ;;  %v276_v25 = vld [vmem:[%s434_s4] ss:$0 sm:$0xff]  ;;  %v237_v32 = vsub.s32 0, %v60_v10  ;;  %v244_v35 = vsub.s32 1, %v60_v10  ;;  %s262_s3 = sshll.u32 %s357_s2, 4  ;;  %s263_s3 = int_to_ptr.vmem [resolvable:$true] %s262_s3 }
  0x18   :  { %s326_s4 = scalar_lea.vmem %s263_s3, 512  ;;  %p331_p9 = scmp.lt.s32.totalorder %s263_s3, %s263_s3 }
  0x19   :  { %p327_p8 = scmp.ne.s32.totalorder %s263_s3, %s326_s4  ;;  %p332_p10 = scmp.lt.s32.totalorder %s326_s4, %s326_s4 }
  0x1a   :  { %43 = vadd.xlane.f32.xlu0 %v42_v5 }
  0x1b   :  { %p333_p11 = por %p332_p10, %p331_p9 }
  0x1d   :  { %p334_p12 = pnand %p333_p11, %p327_p8 }
  0xa3   :  { %v41_v11 = vpop.xlane.xlu0 %40 }
  0xa4   :  { %v45_v13 = vmul.f32 0.00390625, %v41_v11 }
  0xa6   :  { %v62_v16 = vrot.slane %v45_v13, %v61_v12 }
  0xa7   :  { %v44_v14 = vpop.xlane.xlu0 %43 }
  0xa8   :  { %v46_v15 = vmul.f32 0.00390625, %v44_v14 }
  0xaa   :  { %v66_v17 = vrot.slane %v46_v15, %v61_v12 }
  0xac   :  { %v68_v18 = vsel %vm67_vm1, %v66_v17, %v62_v16 }
  0xad   :  { %287 = vmatmul.mubr.msk.f32.vlgmr.msra.gmra.mrb[0].mxu0 %vm69_vm2, %v68_v18 }
 0x180   :  { %v138_v21 = vpop.f32.mrb[0].mxu0 }
 0x181   :  { %v139_v22 = vadd.f32 %v274_v20, %v138_v21  ;;  %v288_v23 = vpop.f32.mrb[1].mxu0 }
 0x183   :  { %v142_v24 = vmax.f32 %v139_v22, 0.0 }
 0x185   :  { %292 = vmatmul.mubr.msk.f32.vlgmr.msra.gmra.mrb[0].mxu1 %vm151_vm4, %v142_v24 }
 0x258   :  { %v225_v26 = vpop.f32.mrb[0].mxu1 }
 0x259   :  { %v226_v27 = vadd.f32 %v276_v25, %v225_v26  ;;  %v293_v28 = vpop.f32.mrb[1].mxu1 }
 0x25b   :  { %v279_v29 = vmul.f32 -1.442695, %v226_v27 }
 0x25d   :  { %300 = vpow2.f32 %v279_v29 }
 0x267   :  { %v301_v30 = vpop.eup %300 }
 0x268   :  { %v232_v31 = vadd.f32 1.0, %v301_v30 }
 0x26a   :  { %302 = vrcp.f32 %v232_v31 }
 0x274   :  { %v303_v33 = vpop.eup %302 }
 0x275   :  { %v238_v34 = vrot.slane %v303_v33, %v237_v32  ;;  %v245_v36 = vrot.slane %v303_v33, %v244_v35 }
 0x277   :  { %240 = vbcast.lane.b32.xlu1 %v238_v34, 256 }
 0x27b   :  { %247 = vbcast.lane.b32.xlu1 %v245_v36, 256 }
 0x2e9   :  { %v241_v37 = vpop.permute.xlu1 %240 }
 0x2ea   :  { %v249_v38 = vmul.f32 %v241_v37, %v35_v0  ;;  %v250_v39 = vmul.f32 %v241_v37, %v36_v1 }
 0x2ec   :  { %253 = vst [vmem:[#allocation5] sm:$0xff] %v249_v38  ;;  %254 = vst [vmem:[#allocation5 + $0x8] sm:$0xff] %v250_v39 }
 0x2ed   :  { %v248_v40 = vpop.permute.xlu1 %247 }
 0x2ee   :  { %v251_v41 = vmul.f32 %v248_v40, %v37_v2  ;;  %v252_v42 = vmul.f32 %v248_v40, %v38_v4 }
 0x2f0   :  { %255 = vst [vmem:[#allocation5 + $0x10] sm:$0xff] %v251_v41  ;;  %256 = vst [vmem:[#allocation5 + $0x18] sm:$0xff] %v252_v42 }
 0x2f1   :  { %337 = shalt.err (!%p334_p12)
}
 0x2f2   :  { %s338_s15 = scalar_lea.hbm %s435_s5, 512 }
 0x2f3   :  { %p339_p13 = scmp.ne.s32.totalorder %s435_s5, %s338_s15  ;;  %p342_p0 = scmp.lt.u32.totalorder %s338_s15, %s435_s5 }
 0x2f5   :  { %p344_p1 = pnand %p342_p0, %p339_p13 }
 0x2f7   :  { %347 = shalt.err (!%p344_p1)
}
 0x2f8   :  { %268 = dma.vmem_to_hbm [thread:$0]  %s263_s3, 512, %s435_s5, [#allocation4], %s353_s28, %s353_s28, %s354_s29  }
 0x2f9   :  { %350 = dma.done.wait [#allocation4], 512  }
 0x2fa   :  { %351 = vsyncadd [#allocation4], 4294966784 }
 0x2fb   :  { %272 = vsyncpa [#allocation3], 1 }
 0x2fc   :  { %273 = vsyncpa [#allocation4], 1 }

</bundles_post_ra>
